<compile_context>
chip_gen: v6e
topology: v6e:2x2x1
jax: 0.10.0
libtpu: 0.0.40
codegen_flags: <defaults>
</compile_context>

<pallas_src>
import functools
import math

import jax
import jax.numpy as jnp
from jax.experimental import pallas as pl
from jax.experimental.pallas import tpu as pltpu


def _flash_sdpa_kernel(q_ref, k_ref, v_ref, o_ref, m_sc, l_sc, acc_sc, *,
                       scale, tk, sk_actual, mask_keys):
    # Kernel view: q (bb, tq, Dk), k (bb, tk, Dk), v (bb, tk, Dv), o (bb, tq, Dv).
    ki = pl.program_id(2)

    @pl.when(ki == 0)
    def _init():
        m_sc[...] = jnp.full_like(m_sc, -jnp.inf)
        l_sc[...] = jnp.zeros_like(l_sc)
        acc_sc[...] = jnp.zeros_like(acc_sc)

    # Fold the 1/sqrt(d_k) scale into q (cheaper than scaling the scores).
    q = q_ref[...] * scale
    k = k_ref[...]
    v = v_ref[...]

    # Attention scores: contract over the feature (lane) dim of both operands
    # -> goes straight to the MXU, no materialized transpose. f32 accumulate.
    s = jnp.einsum("bqd,bkd->bqk", q, k, preferred_element_type=jnp.float32)

    if mask_keys:
        # Only emitted when the key sequence was padded up to a tile multiple.
        key_ids = ki * tk + jax.lax.broadcasted_iota(jnp.int32, s.shape, 2)
        s = jnp.where(key_ids < sk_actual, s, -1e30)

    # Online (flash) softmax update, all statistics in f32.
    m_prev = m_sc[...]
    m_new = jnp.maximum(m_prev, jnp.max(s, axis=-1, keepdims=True))
    alpha = jnp.exp(m_prev - m_new)
    p = jnp.exp(s - m_new)

    l_sc[...] = alpha * l_sc[...] + jnp.sum(p, axis=-1, keepdims=True)
    acc_sc[...] = alpha * acc_sc[...] + jnp.einsum(
        "bqk,bkd->bqd", p.astype(v.dtype), v, preferred_element_type=jnp.float32)
    m_sc[...] = m_new

    @pl.when(ki == pl.num_programs(2) - 1)
    def _finalize():
        l = l_sc[...]
        inv_l = pl.reciprocal(l, approx=True)      # EUP vrcp, own VLIW slot
        inv_l = inv_l * (2.0 - l * inv_l)          # one Newton step on (bb,tq,1): near-f32 accurate, negligible cost
        o_ref[...] = (acc_sc[...] * inv_l).astype(o_ref.dtype)


def _round_up(x, m):
    return (x + m - 1) // m * m


def _largest_divisor_leq(n, cap):
    for d in range(min(n, cap), 0, -1):
        if n % d == 0:
            return d
    return 1


def scaled_dot_product_attention(q, k, v, *, q_tile=256, kv_tile=256,
                                 max_batch_block=8):
    """q: (B, Sq, Dk), k: (B, Sk, Dk), v: (B, Sk, Dv) -> (B, Sq, Dv)."""
    B, Sq, Dk = q.shape
    _, Sk, _ = k.shape
    Dv = v.shape[-1]
    out_dtype = q.dtype
    scale = 1.0 / math.sqrt(Dk)

    # Lane-dense layout: pad feature dims to 128-multiples (zero padding is
    # exact for the QK^T contraction; extra V/output columns are sliced off).
    Dk_p = _round_up(Dk, 128)
    Dv_p = _round_up(Dv, 128)

    # Sequence tiling: single full-extent tile for short sequences, otherwise
    # fixed tiles (multiples of 8) with zero padding up to a tile multiple.
    tq = Sq if Sq <= q_tile else q_tile
    tk = Sk if Sk <= kv_tile else kv_tile
    Sq_p = _round_up(Sq, tq)
    Sk_p = _round_up(Sk, tk)

    # Fold several batch elements into one grid step so tiny per-head shapes
    # still amortize the ~0.35 us per-grid-step overhead.
    bb = _largest_divisor_leq(B, max_batch_block)

    def _maybe_pad(x, pads):
        if any(p for _, p in pads):
            return jnp.pad(x, ((0, 0),) + pads)
        return x

    qp = _maybe_pad(q, ((0, Sq_p - Sq), (0, Dk_p - Dk)))
    kp = _maybe_pad(k, ((0, Sk_p - Sk), (0, Dk_p - Dk)))
    vp = _maybe_pad(v, ((0, Sk_p - Sk), (0, Dv_p - Dv)))

    mask_keys = Sk_p != Sk
    kernel = functools.partial(_flash_sdpa_kernel, scale=scale, tk=tk,
                               sk_actual=Sk, mask_keys=mask_keys)

    out = pl.pallas_call(
        kernel,
        out_shape=jax.ShapeDtypeStruct((B, Sq_p, Dv_p), out_dtype),
        grid_spec=pltpu.PrefetchScalarGridSpec(
            num_scalar_prefetch=0,
            grid=(B // bb, Sq_p // tq, Sk_p // tk),
            in_specs=[
                pl.BlockSpec((bb, tq, Dk_p), lambda b, qi, ki: (b, qi, 0)),
                pl.BlockSpec((bb, tk, Dk_p), lambda b, qi, ki: (b, ki, 0)),
                pl.BlockSpec((bb, tk, Dv_p), lambda b, qi, ki: (b, ki, 0)),
            ],
            out_specs=pl.BlockSpec((bb, tq, Dv_p), lambda b, qi, ki: (b, qi, 0)),
            scratch_shapes=[
                pltpu.VMEM((bb, tq, 1), jnp.float32),      # running max m
                pltpu.VMEM((bb, tq, 1), jnp.float32),      # running sum l
                pltpu.VMEM((bb, tq, Dv_p), jnp.float32),   # unnormalized accumulator
            ],
        ),
        compiler_params=pltpu.CompilerParams(
            dimension_semantics=("parallel", "parallel", "arbitrary"),
        ),
    )(qp, kp, vp)

    if Sq_p != Sq or Dv_p != Dv:
        out = out[:, :Sq, :Dv]
    return out


def _reference(q, k, v):
    dk = q.shape[-1]
    scores = jnp.einsum("bqd,bkd->bqk", q, k) / jnp.sqrt(jnp.float32(dk))
    weights = jax.nn.softmax(scores, axis=-1)
    return jnp.einsum("bqk,bkd->bqd", weights, v)


if __name__ == "__main__":
    key = jax.random.PRNGKey(0)
    kq, kk, kv = jax.random.split(key, 3)

    B, Sq, Sk, Dk, Dv = 2, 8, 8, 32, 32
    q = jax.random.normal(kq, (B, Sq, Dk), dtype=jnp.float32)
    k = jax.random.normal(kk, (B, Sk, Dk), dtype=jnp.float32)
    v = jax.random.normal(kv, (B, Sk, Dv), dtype=jnp.float32)

    out = scaled_dot_product_attention(q, k, v)
    jax.block_until_ready(out)

    ref = _reference(q, k, v)
    assert out.shape == (B, Sq, Dv), out.shape
    assert jnp.allclose(out, ref, atol=1e-4, rtol=1e-4), "mismatch vs reference"

    print("KERNEL_OK")
</pallas_src>

<mosaic_0001>
module attributes {stable_mosaic.version = 11 : i64} {
  func.func @_flash_sdpa_kernel(%arg0: i32, %arg1: i32, %arg2: i32, %arg3: memref<2x8x128xf32, #tpu.memory_space<vmem>>, %arg4: memref<2x8x128xf32, #tpu.memory_space<vmem>>, %arg5: memref<2x8x128xf32, #tpu.memory_space<vmem>>, %arg6: memref<2x8x128xf32, #tpu.memory_space<vmem>>, %arg7: memref<2x8x1xf32, #tpu.memory_space<vmem>>, %arg8: memref<2x8x1xf32, #tpu.memory_space<vmem>>, %arg9: memref<2x8x128xf32, #tpu.memory_space<vmem>>) attributes {dimension_semantics = [#tpu.dimension_semantics<parallel>, #tpu.dimension_semantics<parallel>, #tpu.dimension_semantics<arbitrary>], iteration_bounds = array<i64: 1, 1, 1>, scalar_prefetch = 0 : i64, scratch_operands = 3 : i64, tpu.core_type = #tpu.core_type<tc>, window_params = [{transform_indices = @transform_0, window_bounds = array<i64: 2, 8, 128>}, {transform_indices = @transform_1, window_bounds = array<i64: 2, 8, 128>}, {transform_indices = @transform_2, window_bounds = array<i64: 2, 8, 128>}, {transform_indices = @transform_3, window_bounds = array<i64: 2, 8, 128>}]} {
    %c0_i32 = arith.constant 0 : i32
    %0 = arith.cmpi eq, %arg2, %c0_i32 : i32
    %1 = arith.extui %0 : i1 to i32
    %c0_i32_0 = arith.constant 0 : i32
    %2 = arith.cmpi ne, %1, %c0_i32_0 : i32
    scf.if %2 {
      %cst_33 = arith.constant 0xFF800000 : f32
      %34 = vector.broadcast %cst_33 : f32 to vector<2x8x1xf32>
      %c0_34 = arith.constant 0 : index
      %c0_35 = arith.constant 0 : index
      %c0_36 = arith.constant 0 : index
      %35 = vector.load %arg7[%c0_34, %c0_35, %c0_36] : memref<2x8x1xf32, #tpu.memory_space<vmem>>, vector<2x8x1xf32>
      tpu.vector_store %arg7[%c0_34, %c0_35, %c0_36], %34 {strides = array<i32>} : memref<2x8x1xf32, #tpu.memory_space<vmem>>, vector<2x8x1xf32>,
      %cst_37 = arith.constant 0.000000e+00 : f32
      %36 = vector.broadcast %cst_37 : f32 to vector<2x8x1xf32>
      %c0_38 = arith.constant 0 : index
      %c0_39 = arith.constant 0 : index
      %c0_40 = arith.constant 0 : index
      %37 = vector.load %arg8[%c0_38, %c0_39, %c0_40] : memref<2x8x1xf32, #tpu.memory_space<vmem>>, vector<2x8x1xf32>
      tpu.vector_store %arg8[%c0_38, %c0_39, %c0_40], %36 {strides = array<i32>} : memref<2x8x1xf32, #tpu.memory_space<vmem>>, vector<2x8x1xf32>,
      %cst_41 = arith.constant 0.000000e+00 : f32
      %38 = vector.broadcast %cst_41 : f32 to vector<2x8x128xf32>
      %c0_42 = arith.constant 0 : index
      %c0_43 = arith.constant 0 : index
      %c0_44 = arith.constant 0 : index
      %39 = vector.load %arg9[%c0_42, %c0_43, %c0_44] : memref<2x8x128xf32, #tpu.memory_space<vmem>>, vector<2x8x128xf32>
      tpu.vector_store %arg9[%c0_42, %c0_43, %c0_44], %38 {strides = array<i32>} : memref<2x8x128xf32, #tpu.memory_space<vmem>>, vector<2x8x128xf32>,
    } else {
    }
    %c0 = arith.constant 0 : index
    %c0_1 = arith.constant 0 : index
    %c0_2 = arith.constant 0 : index
    %3 = vector.load %arg3[%c0, %c0_1, %c0_2] : memref<2x8x128xf32, #tpu.memory_space<vmem>>, vector<2x8x128xf32>
    %cst = arith.constant 0.176776692 : f32
    %4 = vector.broadcast %cst : f32 to vector<2x8x128xf32>
    %5 = arith.mulf %3, %4 : vector<2x8x128xf32>
    %c0_3 = arith.constant 0 : index
    %c0_4 = arith.constant 0 : index
    %c0_5 = arith.constant 0 : index
    %6 = vector.load %arg4[%c0_3, %c0_4, %c0_5] : memref<2x8x128xf32, #tpu.memory_space<vmem>>, vector<2x8x128xf32>
    %c0_6 = arith.constant 0 : index
    %c0_7 = arith.constant 0 : index
    %c0_8 = arith.constant 0 : index
    %7 = vector.load %arg5[%c0_6, %c0_7, %c0_8] : memref<2x8x128xf32, #tpu.memory_space<vmem>>, vector<2x8x128xf32>
    "tpu.trace_start"() <{level = 10 : i32, message = "bqd,bkd->bqk"}> : () -> ()
    %cst_9 = arith.constant dense<0.000000e+00> : vector<2x8x8xf32>
    %8 = tpu.matmul %5, %6, %cst_9 {dimension_numbers = #tpu.dot_dimension_numbers<[2], [2], [1], [1], [0, 0, 0, 1, 1, 1], [0], [0]>} : vector<2x8x128xf32>, vector<2x8x128xf32>, vector<2x8x8xf32> -> vector<2x8x8xf32>
    "tpu.trace_stop"() : () -> ()
    %c0_10 = arith.constant 0 : index
    %c0_11 = arith.constant 0 : index
    %c0_12 = arith.constant 0 : index
    %9 = vector.load %arg7[%c0_10, %c0_11, %c0_12] : memref<2x8x1xf32, #tpu.memory_space<vmem>>, vector<2x8x1xf32>
    %cst_13 = arith.constant dense<0xFF800000> : vector<2x8xf32>
    %10 = vector.multi_reduction <maximumf>, %8, %cst_13 [2] : vector<2x8x8xf32> to vector<2x8xf32>
    %11 = vector.shape_cast %10 : vector<2x8xf32> to vector<2x8x1xf32>
    %12 = arith.maximumf %9, %11 : vector<2x8x1xf32>
    %13 = arith.subf %9, %12 : vector<2x8x1xf32>
    %14 = math.exp %13 : vector<2x8x1xf32>
    %15 = vector.broadcast %12 : vector<2x8x1xf32> to vector<2x8x8xf32>
    %16 = arith.subf %8, %15 : vector<2x8x8xf32>
    %17 = math.exp %16 : vector<2x8x8xf32>
    %c0_14 = arith.constant 0 : index
    %c0_15 = arith.constant 0 : index
    %c0_16 = arith.constant 0 : index
    %18 = vector.load %arg8[%c0_14, %c0_15, %c0_16] : memref<2x8x1xf32, #tpu.memory_space<vmem>>, vector<2x8x1xf32>
    %19 = arith.mulf %14, %18 : vector<2x8x1xf32>
    %cst_17 = arith.constant dense<0.000000e+00> : vector<2x8xf32>
    %20 = vector.multi_reduction <add>, %17, %cst_17 [2] : vector<2x8x8xf32> to vector<2x8xf32>
    %21 = vector.shape_cast %20 : vector<2x8xf32> to vector<2x8x1xf32>
    %22 = arith.addf %19, %21 : vector<2x8x1xf32>
    %c0_18 = arith.constant 0 : index
    %c0_19 = arith.constant 0 : index
    %c0_20 = arith.constant 0 : index
    %23 = vector.load %arg8[%c0_18, %c0_19, %c0_20] : memref<2x8x1xf32, #tpu.memory_space<vmem>>, vector<2x8x1xf32>
    tpu.vector_store %arg8[%c0_18, %c0_19, %c0_20], %22 {strides = array<i32>} : memref<2x8x1xf32, #tpu.memory_space<vmem>>, vector<2x8x1xf32>,
    %c0_21 = arith.constant 0 : index
    %c0_22 = arith.constant 0 : index
    %c0_23 = arith.constant 0 : index
    %24 = vector.load %arg9[%c0_21, %c0_22, %c0_23] : memref<2x8x128xf32, #tpu.memory_space<vmem>>, vector<2x8x128xf32>
    %25 = vector.broadcast %14 : vector<2x8x1xf32> to vector<2x8x128xf32>
    %26 = arith.mulf %25, %24 : vector<2x8x128xf32>
    "tpu.trace_start"() <{level = 10 : i32, message = "bqk,bkd->bqd"}> : () -> ()
    %cst_24 = arith.constant dense<0.000000e+00> : vector<2x8x128xf32>
    %27 = tpu.matmul %17, %7, %cst_24 {dimension_numbers = #tpu.dot_dimension_numbers<[2], [1], [1], [2], [0, 0, 0, 1, 1, 2], [0], [0]>} : vector<2x8x8xf32>, vector<2x8x128xf32>, vector<2x8x128xf32> -> vector<2x8x128xf32>
    "tpu.trace_stop"() : () -> ()
    %28 = arith.addf %26, %27 : vector<2x8x128xf32>
    %c0_25 = arith.constant 0 : index
    %c0_26 = arith.constant 0 : index
    %c0_27 = arith.constant 0 : index
    %29 = vector.load %arg9[%c0_25, %c0_26, %c0_27] : memref<2x8x128xf32, #tpu.memory_space<vmem>>, vector<2x8x128xf32>
    tpu.vector_store %arg9[%c0_25, %c0_26, %c0_27], %28 {strides = array<i32>} : memref<2x8x128xf32, #tpu.memory_space<vmem>>, vector<2x8x128xf32>,
    %c0_28 = arith.constant 0 : index
    %c0_29 = arith.constant 0 : index
    %c0_30 = arith.constant 0 : index
    %30 = vector.load %arg7[%c0_28, %c0_29, %c0_30] : memref<2x8x1xf32, #tpu.memory_space<vmem>>, vector<2x8x1xf32>
    tpu.vector_store %arg7[%c0_28, %c0_29, %c0_30], %12 {strides = array<i32>} : memref<2x8x1xf32, #tpu.memory_space<vmem>>, vector<2x8x1xf32>,
    %c0_i32_31 = arith.constant 0 : i32
    %31 = arith.cmpi eq, %arg2, %c0_i32_31 : i32
    %32 = arith.extui %31 : i1 to i32
    %c0_i32_32 = arith.constant 0 : i32
    %33 = arith.cmpi ne, %32, %c0_i32_32 : i32
    scf.if %33 {
      %c0_33 = arith.constant 0 : index
      %c0_34 = arith.constant 0 : index
      %c0_35 = arith.constant 0 : index
      %34 = vector.load %arg8[%c0_33, %c0_34, %c0_35] : memref<2x8x1xf32, #tpu.memory_space<vmem>>, vector<2x8x1xf32>
      %35 = tpu.reciprocal %34 {approx = true} : vector<2x8x1xf32> -> vector<2x8x1xf32>
      %36 = arith.mulf %34, %35 : vector<2x8x1xf32>
      %cst_36 = arith.constant 2.000000e+00 : f32
      %37 = vector.broadcast %cst_36 : f32 to vector<2x8x1xf32>
      %38 = arith.subf %37, %36 : vector<2x8x1xf32>
      %39 = arith.mulf %35, %38 : vector<2x8x1xf32>
      %c0_37 = arith.constant 0 : index
      %c0_38 = arith.constant 0 : index
      %c0_39 = arith.constant 0 : index
      %40 = vector.load %arg9[%c0_37, %c0_38, %c0_39] : memref<2x8x128xf32, #tpu.memory_space<vmem>>, vector<2x8x128xf32>
      %41 = vector.broadcast %39 : vector<2x8x1xf32> to vector<2x8x128xf32>
      %42 = arith.mulf %40, %41 : vector<2x8x128xf32>
      %c0_40 = arith.constant 0 : index
      %c0_41 = arith.constant 0 : index
      %c0_42 = arith.constant 0 : index
      %43 = vector.load %arg6[%c0_40, %c0_41, %c0_42] : memref<2x8x128xf32, #tpu.memory_space<vmem>>, vector<2x8x128xf32>
      tpu.vector_store %arg6[%c0_40, %c0_41, %c0_42], %42 {strides = array<i32>} : memref<2x8x128xf32, #tpu.memory_space<vmem>>, vector<2x8x128xf32>,
    } else {
    }
    return
  }
  func.func @transform_0(%arg0: i32, %arg1: i32, %arg2: i32) -> (i32, i32, i32) {
    %c0_i32 = arith.constant 0 : i32
    %c0_i32_0 = arith.constant 0 : i32
    return %arg0, %arg1, %c0_i32 : i32, i32, i32
  }
  func.func @transform_1(%arg0: i32, %arg1: i32, %arg2: i32) -> (i32, i32, i32) {
    %c0_i32 = arith.constant 0 : i32
    %c0_i32_0 = arith.constant 0 : i32
    return %arg0, %arg2, %c0_i32 : i32, i32, i32
  }
  func.func @transform_2(%arg0: i32, %arg1: i32, %arg2: i32) -> (i32, i32, i32) {
    %c0_i32 = arith.constant 0 : i32
    %c0_i32_0 = arith.constant 0 : i32
    return %arg0, %arg2, %c0_i32 : i32, i32, i32
  }
  func.func @transform_3(%arg0: i32, %arg1: i32, %arg2: i32) -> (i32, i32, i32) {
    %c0_i32 = arith.constant 0 : i32
    %c0_i32_0 = arith.constant 0 : i32
    return %arg0, %arg1, %c0_i32 : i32, i32, i32
  }
}

</mosaic_0001>

<bundles_post_ra>
// kernel: tpu_custom_call.1
= control target key start
LH: loop header
LB: loop body
LE: loop exit
PB: predicated region body
PF: predicated region fallthrough
CT: control target
= control target key end

     0   :  { %8 = vsyncpa [#allocation6], 0  ;;  %s688_s0 = inlined_call_operand.hbm [shape: f32[2,8,128], index: 0, kind: input, shape index: {}]   ;;  %s689_s1 = inlined_call_operand.hbm [shape: f32[2,8,128], index: 1, kind: input, shape index: {}]   ;;  %s690_s2 = inlined_call_operand.hbm [shape: f32[2,8,128], index: 2, kind: input, shape index: {}]   ;;  %s691_s3 = inlined_call_operand.hbm [shape: f32[2,8,128], index: 3, kind: output, shape index: {}]  }
   0x1   :  { %9 = vsyncpa [#allocation9], 0 }
   0x2   :  { %10 = vsyncpa [#allocation7], 0  ;;  %s616_s12 = smov [#allocation8]   ;;  %s617_s14 = smov [#allocation5]  }
   0x3   :  { %s28_s13 = sshll.u32 %s616_s12, 4  ;;  %s16_s15 = sshll.u32 %s617_s14, 4  ;;  %s29_s13 = int_to_ptr.vmem [resolvable:$true] %s28_s13  ;;  %s17_s15 = int_to_ptr.vmem [resolvable:$true] %s16_s15 }
   0x4   :  { %s538_s16 = scalar_lea.vmem %s29_s13, 256  ;;  %p543_p1 = scmp.lt.s32.totalorder %s29_s13, %s29_s13 }
   0x5   :  { %p539_p0 = scmp.ne.s32.totalorder %s29_s13, %s538_s16  ;;  %p544_p2 = scmp.lt.s32.totalorder %s538_s16, %s538_s16 }
   0x7   :  { %p545_p3 = por %p544_p2, %p543_p1 }
   0x9   :  { %p546_p4 = pnand %p545_p3, %p539_p0 }
   0xb   :  { %549 = shalt.err (!%p546_p4)
}
   0xc   :  { %s618_s17 = smov 128   ;;  %s619_s18 = smov 8  }
   0xd   :  { %34 = dma.hbm_to_vmem [thread:$0]  %s689_s1, 256, %s29_s13, [#allocation9], %s618_s17, %s618_s17, %s619_s18  }
   0xe   :  { %s558_s21 = scalar_lea.vmem %s17_s15, 256  ;;  %p563_p6 = scmp.lt.s32.totalorder %s17_s15, %s17_s15 }
   0xf   :  { %p559_p5 = scmp.ne.s32.totalorder %s17_s15, %s558_s21  ;;  %p564_p7 = scmp.lt.s32.totalorder %s558_s21, %s558_s21 }
  0x11   :  { %p565_p8 = por %p564_p7, %p563_p6 }
  0x13   :  { %p566_p9 = pnand %p565_p8, %p559_p5 }
  0x15   :  { %569 = shalt.err (!%p566_p9)
}
  0x16   :  { %22 = dma.hbm_to_vmem [thread:$0]  %s688_s0, 256, %s17_s15, [#allocation6], %s618_s17, %s618_s17, %s619_s18  }
  0x17   :  { %s620_s24 = smov [#allocation10]  }
  0x18   :  { %s40_s25 = sshll.u32 %s620_s24, 4  ;;  %s41_s25 = int_to_ptr.vmem [resolvable:$true] %s40_s25 }
  0x19   :  { %s578_s26 = scalar_lea.vmem %s41_s25, 256  ;;  %p583_p11 = scmp.lt.s32.totalorder %s41_s25, %s41_s25 }
  0x1a   :  { %p579_p10 = scmp.ne.s32.totalorder %s41_s25, %s578_s26  ;;  %p584_p12 = scmp.lt.s32.totalorder %s578_s26, %s578_s26 }
  0x1c   :  { %p585_p13 = por %p584_p12, %p583_p11 }
  0x1e   :  { %p586_p0 = pnand %p585_p13, %p579_p10 }
  0x20   :  { %589 = shalt.err (!%p586_p0)
}
  0x21   :  { %46 = dma.hbm_to_vmem [thread:$0]  %s690_s2, 256, %s41_s25, [#allocation9], %s618_s17, %s618_s17, %s619_s18  }
  0x22   :  { %610 = dma.done.wait [#allocation6], 256  }
  0x23   :  { %611 = vsyncadd [#allocation6], 4294967040 }
  0x24   :  { %612 = dma.done.wait [#allocation9], 512  }
  0x25   :  { %613 = vsyncadd [#allocation9], 4294966784  ;;  %v621_v0 = vmov 0.0   ;;  %vm622_vm0 = vmmov 0   ;;  %v71_v1 = vld [vmem:[#allocation8] sm:$0xff]  ;;  %v72_v2 = vld [vmem:[#allocation8 + $0x8] sm:$0xff] }
  0x26   :  { %486 = vmatprep.subr.mxu0 %v621_v0  ;;  %491 = vmatprep.subr.mxu1 %v621_v0  ;;  %v67_v3 = vld [vmem:[#allocation5] sm:$0xff]  ;;  %v68_v5 = vld [vmem:[#allocation5 + $0x8] sm:$0xff]  ;;  %vm60_vm1 = vcmask 7168   ;;  %v623_v7 = vmov -inf   ;;  %vm217_vm2 = vcmask 64512   ;;  %v624_v14 = vmov 0  }
  0x27   :  { %488 = vmatprep.mubr.msk.f32.mxu0 %vm622_vm0, %v621_v0  ;;  %493 = vmatprep.mubr.msk.f32.mxu1 %vm622_vm0, %v621_v0  ;;  %v69_v4 = vmul.f32 0.17677669, %v67_v3  ;;  %v70_v6 = vmul.f32 0.17677669, %v68_v5  ;;  %61 = vst.msk [vmem:[#allocation2] sm:$0xff] %vm60_vm1, %v623_v7  ;;  %62 = vst.msk [vmem:[#allocation2 + $0x8] sm:$0xff] %vm60_vm1, %v623_v7 }
  0x28   :  { %487 = vmatpush3.xpose.msra.mxu0 %v71_v1  ;;  %492 = vmatpush3.xpose.msra.mxu1 %v72_v2  ;;  %63 = vst.msk [vmem:[#allocation3] sm:$0xff] %vm60_vm1, %v621_v0  ;;  %64 = vst.msk [vmem:[#allocation3 + $0x8] sm:$0xff] %vm60_vm1, %v621_v0  ;;  %v73_v23 = vld [vmem:[#allocation10] sm:$0xff]  ;;  %v74_v24 = vld [vmem:[#allocation10 + $0x8] sm:$0xff]  ;;  %s625_s0 = smov [#allocation11]  }
  0x29   :  { %496 = vmatprep.subr.mxu0 %v621_v0  ;;  %501 = vmatprep.subr.mxu1 %v621_v0  ;;  %s463_s2 = sshll.u32 %s625_s0, 4  ;;  %s464_s2 = int_to_ptr.vmem [resolvable:$true] %s463_s2 }
  0x2a   :  { %516 = vset.pattern.permute.xlu1 %v624_v14  ;;  %517 = vset.pattern.permute.xlu0 %v624_v14  ;;  %s590_s28 = scalar_lea.vmem %s464_s2, 256  ;;  %p595_p2 = scmp.lt.s32.totalorder %s464_s2, %s464_s2 }
  0x2b   :  { %489 = vmatmul.mubr.f32.vlgmr.msra.gmra.mxu0 %v69_v4  ;;  %494 = vmatmul.mubr.f32.vlgmr.msra.gmra.mxu1 %v70_v6  ;;  %p591_p1 = scmp.ne.s32.totalorder %s464_s2, %s590_s28  ;;  %p596_p3 = scmp.lt.s32.totalorder %s590_s28, %s590_s28 }
  0x2c   :  { %498 = vmatprep.mubr.msk.f32.mxu0 %vm622_vm0, %v621_v0  ;;  %503 = vmatprep.mubr.msk.f32.mxu1 %vm622_vm0, %v621_v0 }
  0x2d   :  { %497 = vmatpush3.msra.mxu0 %v73_v23  ;;  %502 = vmatpush3.msra.mxu1 %v74_v24  ;;  %p597_p4 = por %p596_p3, %p595_p2 }
  0x2e   :  { %v215_v15 = vld [vmem:[#allocation2] sm:$0xff]  ;;  %v216_v18 = vld [vmem:[#allocation2 + $0x8] sm:$0xff] }
  0x2f   :  { %v248_v39 = vld [vmem:[#allocation3] sm:$0xff]  ;;  %v249_v42 = vld [vmem:[#allocation3 + $0x8] sm:$0xff]  ;;  %p598_p5 = pnand %p597_p4, %p591_p1 }
  0xeb   :  { %v141_v8 = vpop.f32.mrf.mxu0  ;;  %v211_v9 = vpop.f32.mrf.mxu1 }
  0xec   :  { %v218_v10 = vsel %vm217_vm2, %v141_v8, -inf  ;;  %v221_v13 = vsel %vm217_vm2, %v211_v9, -inf }
  0xed   :  { %219 = vmax.xlane.f32.xlu0 %v218_v10  ;;  %v490_v11 = vpop.f32.mrf.mxu0  ;;  %v495_v12 = vpop.f32.mrf.mxu1 }
  0xf1   :  { %222 = vmax.xlane.f32.xlu0 %v221_v13 }
 0x176   :  { %v220_v16 = vpop.xlane.xlu0 %219 }
 0x177   :  { %v224_v17 = vmax.f32 %v215_v15, %v220_v16 }
 0x179   :  { %v226_v19 = vsub.f32 %v215_v15, %v224_v17  ;;  %427 = vst.msk [vmem:[#allocation2] sm:$0xff] %vm60_vm1, %v224_v17  ;;  %234 = vperm.xlu1 %516, %v224_v17  }
 0x17a   :  { %v223_v20 = vpop.xlane.xlu0 %222 }
 0x17b   :  { %v225_v21 = vmax.f32 %v216_v18, %v223_v20  ;;  %v228_v36 = vmul.f32 1.442695, %v226_v19 }
 0x17d   :  { %v227_v22 = vsub.f32 %v216_v18, %v225_v21  ;;  %428 = vst.msk [vmem:[#allocation2 + $0x8] sm:$0xff] %vm60_vm1, %v225_v21  ;;  %239 = vperm.xlu1 %516, %v225_v21  }
 0x17f   :  { %v230_v34 = vmul.f32 1.442695, %v227_v22 }
 0x1f4   :  { %v235_v25 = vpop.permute.xlu1 %234 }
 0x1f5   :  { %v242_v26 = vsub.f32 %v141_v8, %v235_v25 }
 0x1f7   :  { %v244_v27 = vmul.f32 1.442695, %v242_v26 }
 0x1f8   :  { %v240_v28 = vpop.permute.xlu1 %239 }
 0x1f9   :  { %518 = vpow2.f32 %v244_v27  ;;  %v243_v29 = vsub.f32 %v211_v9, %v240_v28 }
 0x1fb   :  { %v246_v30 = vmul.f32 1.442695, %v243_v29 }
 0x1fd   :  { %520 = vpow2.f32 %v246_v30 }
 0x1fe   :  { %522 = vpow2.f32 %v230_v34 }
 0x1ff   :  { %524 = vpow2.f32 %v228_v36 }
 0x206   :  { %v519_v31 = vpop.eup %518 }
 0x207   :  { %499 = vmatmul.mubr.msk.f32.vlgmr.msra.gmra.mxu0 %vm217_vm2, %v519_v31  ;;  %v252_v32 = vsel %vm217_vm2, %v519_v31, 0.0 }
 0x208   :  { %253 = vadd.xlane.f32.xlu0 %v252_v32 }
 0x20a   :  { %v521_v33 = vpop.eup %520 }
 0x20b   :  { %504 = vmatmul.mubr.msk.f32.vlgmr.msra.gmra.mxu1 %vm217_vm2, %v521_v33  ;;  %v255_v35 = vsel %vm217_vm2, %v521_v33, 0.0  ;;  %v523_v37 = vpop.eup %522 }
 0x20c   :  { %256 = vadd.xlane.f32.xlu1 %v255_v35  ;;  %v525_v38 = vpop.eup %524  ;;  %v251_v44 = vmul.f32 %v523_v37, %v249_v42 }
 0x20d   :  { %v250_v40 = vmul.f32 %v525_v38, %v248_v39 }
 0x21d   :  { %272 = vperm.xlu1 %516, %v523_v37  }
 0x21e   :  { %267 = vperm.xlu0 %517, %v525_v38  }
 0x291   :  { %v254_v41 = vpop.xlane.xlu0 %253 }
 0x292   :  { %v258_v43 = vadd.f32 %v254_v41, %v250_v40 }
 0x294   :  { %261 = vst.msk [vmem:[#allocation3] sm:$0xff] %vm60_vm1, %v258_v43 }
 0x295   :  { %v257_v45 = vpop.xlane.xlu1 %256 }
 0x296   :  { %v259_v46 = vadd.f32 %v257_v45, %v251_v44 }
 0x298   :  { %262 = vst.msk [vmem:[#allocation3 + $0x8] sm:$0xff] %vm60_vm1, %v259_v46 }
 0x299   :  { %v268_v61 = vpop.permute.xlu0 %267  ;;  %v273_v63 = vpop.permute.xlu1 %272 }
 0x29a   :  { %v275_v62 = vmul.f32 0.0, %v268_v61  ;;  %v276_v2 = vmul.f32 0.0, %v273_v63 }
 0x29b   :  { %v432_v47 = vld [vmem:[#allocation3] sm:$0xff] }
 0x29c   :  { %526 = vrcp.f32 %v432_v47 }
 0x29f   :  { %v433_v48 = vld [vmem:[#allocation3 + $0x8] sm:$0xff] }
 0x2a0   :  { %528 = vrcp.f32 %v433_v48 }
 0x2a9   :  { %v527_v49 = vpop.eup %526 }
 0x2aa   :  { %v436_v50 = vmul.f32 %v527_v49, %v432_v47 }
 0x2ac   :  { %v438_v51 = vsub.f32 2.0, %v436_v50 }
 0x2ad   :  { %v529_v52 = vpop.eup %528 }
 0x2ae   :  { %v440_v53 = vmul.f32 %v527_v49, %v438_v51  ;;  %v437_v54 = vmul.f32 %v529_v52, %v433_v48 }
 0x2b0   :  { %446 = vperm.xlu0 %517, %v440_v53   ;;  %v439_v55 = vsub.f32 2.0, %v437_v54 }
 0x2b2   :  { %v441_v56 = vmul.f32 %v529_v52, %v439_v55 }
 0x2b4   :  { %451 = vperm.xlu0 %517, %v441_v56  }
 0x2c7   :  { %v346_v57 = vpop.f32.mrf.mxu0 }
 0x2c8   :  { %v423_v0 = vadd.f32 %v346_v57, %v275_v62 }
 0x2c9   :  { %v500_v58 = vpop.f32.mrf.mxu0 }
 0x2cb   :  { %v419_v59 = vpop.f32.mrf.mxu1 }
 0x2cc   :  { %v424_v4 = vadd.f32 %v419_v59, %v276_v2 }
 0x2cd   :  { %v505_v60 = vpop.f32.mrf.mxu1 }
 0x32b   :  { %v447_v1 = vpop.permute.xlu0 %446 }
 0x32c   :  { %v454_v3 = vmul.f32 %v447_v1, %v423_v0 }
 0x32e   :  { %456 = vst [vmem:[#allocation11] sm:$0xff] %v454_v3 }
 0x32f   :  { %v452_v5 = vpop.permute.xlu0 %451 }
 0x330   :  { %v455_v6 = vmul.f32 %v452_v5, %v424_v4 }
 0x332   :  { %457 = vst [vmem:[#allocation11 + $0x8] sm:$0xff] %v455_v6 }
 0x333   :  { %601 = shalt.err (!%p598_p5)
}
 0x334   :  { %469 = dma.vmem_to_hbm [thread:$0]  %s464_s2, 256, %s691_s3, [#allocation7], %s618_s17, %s618_s17, %s619_s18  }
 0x335   :  { %614 = dma.done.wait [#allocation7], 256  }
 0x336   :  { %615 = vsyncadd [#allocation7], 4294967040 }
 0x337   :  { %473 = vsyncpa [#allocation6], 1 }
 0x338   :  { %474 = vsyncpa [#allocation9], 1 }
 0x339   :  { %475 = vsyncpa [#allocation7], 1 }

</bundles_post_ra>
